<compile_context>
chip_gen: v6e
topology: v6e:2x2x1
jax: 0.10.0
libtpu: 0.0.40
codegen_flags: <defaults>
</compile_context>

<pallas_src>
import functools

import jax
import jax.numpy as jnp
from jax.experimental import pallas as pl
from jax.experimental.pallas import tpu as pltpu

H1 = 128        # fc1 output width (already lane-dense)
H2 = 200        # fc2 logical output width
H2_PAD = 256    # fc2 padded output width (2 x 128 lane tiles)
OUT_PAD = 128   # fc3 padded output width (lane-dense store; slice to act_dims)


def pack_params(params, obs_dims, act_dims):
    """Pack (w1,b1,w2,b2,w3,b3) into a single (516+obs, 128) f32 buffer.

    Row layout (all rows are 128 lanes wide):
      [  0,128)  w2a : fc2 weight, output cols   0..128
      [128,256)  w2b : fc2 weight, output cols 128..256 (200..256 zero pad)
      [256,384)  w3a : fc3 weight, input rows    0..128 (out padded to 128)
      [384,512)  w3b : fc3 weight, input rows  128..256 (200..256 zero rows)
      [512,512+obs)  w1  : fc1 weight (obs, 128)
      512+obs        b1
      513+obs        b2a (fc2 bias cols   0..128)
      514+obs        b2b (fc2 bias cols 128..256, zero padded)
      515+obs        b3  (fc3 bias, zero padded to 128)
    """
    w1, b1, w2, b2, w3, b3 = params
    w2p = jnp.zeros((H1, H2_PAD), jnp.float32).at[:, :H2].set(w2)
    b2p = jnp.zeros((H2_PAD,), jnp.float32).at[:H2].set(b2)
    w3p = jnp.zeros((H2_PAD, OUT_PAD), jnp.float32).at[:H2, :act_dims].set(w3)
    b3p = jnp.zeros((OUT_PAD,), jnp.float32).at[:act_dims].set(b3)
    rows = [
        w2p[:, :H1],                 # w2a  (128,128)
        w2p[:, H1:],                 # w2b  (128,128)
        w3p[:H1, :],                 # w3a  (128,128)
        w3p[H1:, :],                 # w3b  (128,128)
        w1,                          # w1   (obs,128)
        b1.reshape(1, H1),           # b1
        b2p[:H1].reshape(1, H1),     # b2a
        b2p[H1:].reshape(1, H1),     # b2b
        b3p.reshape(1, OUT_PAD),     # b3
    ]
    packed = jnp.concatenate(rows, axis=0)
    assert packed.shape == (516 + obs_dims, 128)
    return packed


def actor_kernel(x_ref, p_ref, o_ref, *, obs_dims):
    tm = x_ref.shape[0]
    x = x_ref[...]                                   # (tm, obs_dims)

    # Static row offsets into the packed parameter buffer.
    W2A, W2B, W3A, W3B = 0, H1, 2 * H1, 3 * H1
    W1 = 4 * H1
    B1 = W1 + obs_dims
    B2A, B2B, B3 = B1 + 1, B1 + 2, B1 + 3

    # ---- fc1 on the VPU: h1 = sum_k x[:, k] (x) w1[k, :] + b1, then ReLU ----
    h1 = x[:, 0:1] * p_ref[W1:W1 + 1, :]
    for k in range(1, obs_dims):                     # tiny static unroll
        h1 = h1 + x[:, k:k + 1] * p_ref[W1 + k:W1 + k + 1, :]
    h1 = jnp.maximum(h1 + p_ref[B1:B1 + 1, :], 0.0)  # (tm, 128)

    # ---- fc2 on the MXU, output split into two lane-dense 128-wide tiles ----
    h2a = jnp.maximum(
        jnp.dot(h1, p_ref[W2A:W2A + H1, :], preferred_element_type=jnp.float32)
        + p_ref[B2A:B2A + 1, :], 0.0)
    h2b = jnp.maximum(
        jnp.dot(h1, p_ref[W2B:W2B + H1, :], preferred_element_type=jnp.float32)
        + p_ref[B2B:B2B + 1, :], 0.0)

    # ---- fc3 on the MXU, K split over the two fc2 tiles, output padded ----
    h3 = (jnp.dot(h2a, p_ref[W3A:W3A + H1, :], preferred_element_type=jnp.float32)
          + jnp.dot(h2b, p_ref[W3B:W3B + H1, :], preferred_element_type=jnp.float32)
          + p_ref[B3:B3 + 1, :])
    o_ref[...] = jnp.tanh(h3).astype(o_ref.dtype)    # lane-dense (tm, 128) store


def actor_forward(x, packed_params, *, obs_dims, act_dims, tile_m=256):
    """x: (B, obs_dims) f32 -> (B, act_dims) f32."""
    B = x.shape[0]
    assert x.shape[1] == obs_dims

    if B <= tile_m:
        tm, bp = B, B                      # single block, full batch
    else:
        tm = tile_m
        bp = ((B + tm - 1) // tm) * tm
        if bp != B:
            x = jnp.pad(x, ((0, bp - B), (0, 0)))
    grid_m = bp // tm

    kernel = functools.partial(actor_kernel, obs_dims=obs_dims)
    out = pl.pallas_call(
        kernel,
        out_shape=jax.ShapeDtypeStruct((bp, OUT_PAD), jnp.float32),
        grid=(grid_m,),
        in_specs=[
            pl.BlockSpec((tm, obs_dims), lambda i: (i, 0)),
            # Constant index_map -> packed params stay VMEM-resident.
            pl.BlockSpec(packed_params.shape, lambda i: (0, 0)),
        ],
        out_specs=pl.BlockSpec((tm, OUT_PAD), lambda i: (i, 0)),
        compiler_params=pltpu.CompilerParams(
            dimension_semantics=("parallel",)),
    )(x, packed_params)
    return out[:B, :act_dims]


def init_params(key, obs_dims, act_dims):
    """torch.nn.Linear default init: U(-1/sqrt(fan_in), 1/sqrt(fan_in)).
    Weights stored as (in_features, out_features); biases as vectors."""
    def linear(key, fan_in, fan_out):
        kw, kb = jax.random.split(key)
        bound = 1.0 / (fan_in ** 0.5)
        w = jax.random.uniform(kw, (fan_in, fan_out), jnp.float32, -bound, bound)
        b = jax.random.uniform(kb, (fan_out,), jnp.float32, -bound, bound)
        return w, b

    k1, k2, k3 = jax.random.split(key, 3)
    w1, b1 = linear(k1, obs_dims, H1)
    w2, b2 = linear(k2, H1, H2)
    w3, b3 = linear(k3, H2, act_dims)
    return (w1, b1, w2, b2, w3, b3)


def actor_forward_ref(x, params):
    w1, b1, w2, b2, w3, b3 = params
    h1 = jnp.maximum(x @ w1 + b1, 0.0)
    h2 = jnp.maximum(h1 @ w2 + b2, 0.0)
    return jnp.tanh(h2 @ w3 + b3)


if __name__ == "__main__":
    # Pendulum-like dims: obs_space_dims=3, action_space_dims=1.
    obs_dims, act_dims, batch = 3, 1, 8

    key = jax.random.PRNGKey(0)
    k_params, k_x, k_x2 = jax.random.split(key, 3)
    params = init_params(k_params, obs_dims, act_dims)
    packed = pack_params(params, obs_dims, act_dims)

    # Small batch: single block, no grid tiling.
    x = jax.random.normal(k_x, (batch, obs_dims), jnp.float32)
    out = jax.block_until_ready(
        actor_forward(x, packed, obs_dims=obs_dims, act_dims=act_dims))
    ref = actor_forward_ref(x, params)
    assert out.shape == (batch, act_dims)
    assert jnp.allclose(out, ref, atol=1e-5, rtol=1e-5)

    # Larger batch exercises the parallel batch grid + edge padding path.
    x2 = jax.random.normal(k_x2, (300, obs_dims), jnp.float32)
    out2 = jax.block_until_ready(
        actor_forward(x2, packed, obs_dims=obs_dims, act_dims=act_dims, tile_m=128))
    ref2 = actor_forward_ref(x2, params)
    assert out2.shape == (300, act_dims)
    assert jnp.allclose(out2, ref2, atol=1e-5, rtol=1e-5)

    print("KERNEL_OK")
</pallas_src>

<mosaic_0001>
module attributes {stable_mosaic.version = 11 : i64} {
  func.func @actor_kernel(%arg0: i32, %arg1: memref<8x3xf32, #tpu.memory_space<vmem>>, %arg2: memref<519x128xf32, #tpu.memory_space<vmem>>, %arg3: memref<8x128xf32, #tpu.memory_space<vmem>>) attributes {dimension_semantics = [#tpu.dimension_semantics<parallel>], iteration_bounds = array<i64: 1>, scalar_prefetch = 0 : i64, scratch_operands = 0 : i64, tpu.core_type = #tpu.core_type<tc>, window_params = [{transform_indices = @transform_0, window_bounds = array<i64: 8, 3>}, {pipeline_mode = #tpu.pipeline_mode<synchronous>, transform_indices = @transform_1, window_bounds = array<i64: 519, 128>}, {transform_indices = @transform_2, window_bounds = array<i64: 8, 128>}]} {
    %c0 = arith.constant 0 : index
    %c0_0 = arith.constant 0 : index
    %0 = vector.load %arg1[%c0, %c0_0] : memref<8x3xf32, #tpu.memory_space<vmem>>, vector<8x3xf32>
    %1 = vector.extract_strided_slice %0 {offsets = [0, 0], sizes = [8, 1], strides = [1, 1]} : vector<8x3xf32> to vector<8x1xf32>
    %c512 = arith.constant 512 : index
    %c0_1 = arith.constant 0 : index
    %2 = vector.load %arg2[%c512, %c0_1] : memref<519x128xf32, #tpu.memory_space<vmem>>, vector<1x128xf32>
    %3 = vector.broadcast %1 : vector<8x1xf32> to vector<8x128xf32>
    %4 = vector.broadcast %2 : vector<1x128xf32> to vector<8x128xf32>
    %5 = arith.mulf %3, %4 : vector<8x128xf32>
    %6 = vector.extract_strided_slice %0 {offsets = [0, 1], sizes = [8, 1], strides = [1, 1]} : vector<8x3xf32> to vector<8x1xf32>
    %c513 = arith.constant 513 : index
    %c0_2 = arith.constant 0 : index
    %7 = vector.load %arg2[%c513, %c0_2] : memref<519x128xf32, #tpu.memory_space<vmem>>, vector<1x128xf32>
    %8 = vector.broadcast %6 : vector<8x1xf32> to vector<8x128xf32>
    %9 = vector.broadcast %7 : vector<1x128xf32> to vector<8x128xf32>
    %10 = arith.mulf %8, %9 : vector<8x128xf32>
    %11 = arith.addf %5, %10 : vector<8x128xf32>
    %12 = vector.extract_strided_slice %0 {offsets = [0, 2], sizes = [8, 1], strides = [1, 1]} : vector<8x3xf32> to vector<8x1xf32>
    %c514 = arith.constant 514 : index
    %c0_3 = arith.constant 0 : index
    %13 = vector.load %arg2[%c514, %c0_3] : memref<519x128xf32, #tpu.memory_space<vmem>>, vector<1x128xf32>
    %14 = vector.broadcast %12 : vector<8x1xf32> to vector<8x128xf32>
    %15 = vector.broadcast %13 : vector<1x128xf32> to vector<8x128xf32>
    %16 = arith.mulf %14, %15 : vector<8x128xf32>
    %17 = arith.addf %11, %16 : vector<8x128xf32>
    %c515 = arith.constant 515 : index
    %c0_4 = arith.constant 0 : index
    %18 = vector.load %arg2[%c515, %c0_4] : memref<519x128xf32, #tpu.memory_space<vmem>>, vector<1x128xf32>
    %19 = vector.broadcast %18 : vector<1x128xf32> to vector<8x128xf32>
    %20 = arith.addf %17, %19 : vector<8x128xf32>
    %cst = arith.constant 0.000000e+00 : f32
    %21 = vector.broadcast %cst : f32 to vector<8x128xf32>
    %22 = arith.maximumf %20, %21 : vector<8x128xf32>
    %c0_5 = arith.constant 0 : index
    %c0_6 = arith.constant 0 : index
    %23 = vector.load %arg2[%c0_5, %c0_6] : memref<519x128xf32, #tpu.memory_space<vmem>>, vector<128x128xf32>
    %cst_7 = arith.constant dense<0.000000e+00> : vector<8x128xf32>
    %24 = tpu.matmul %22, %23, %cst_7 {dimension_numbers = #tpu.dot_dimension_numbers<[1], [0], [0], [1], [0, 0, 1, 1], [], []>} : vector<8x128xf32>, vector<128x128xf32>, vector<8x128xf32> -> vector<8x128xf32>
    %c516 = arith.constant 516 : index
    %c0_8 = arith.constant 0 : index
    %25 = vector.load %arg2[%c516, %c0_8] : memref<519x128xf32, #tpu.memory_space<vmem>>, vector<1x128xf32>
    %26 = vector.broadcast %25 : vector<1x128xf32> to vector<8x128xf32>
    %27 = arith.addf %24, %26 : vector<8x128xf32>
    %cst_9 = arith.constant 0.000000e+00 : f32
    %28 = vector.broadcast %cst_9 : f32 to vector<8x128xf32>
    %29 = arith.maximumf %27, %28 : vector<8x128xf32>
    %c128 = arith.constant 128 : index
    %c0_10 = arith.constant 0 : index
    %30 = vector.load %arg2[%c128, %c0_10] : memref<519x128xf32, #tpu.memory_space<vmem>>, vector<128x128xf32>
    %cst_11 = arith.constant dense<0.000000e+00> : vector<8x128xf32>
    %31 = tpu.matmul %22, %30, %cst_11 {dimension_numbers = #tpu.dot_dimension_numbers<[1], [0], [0], [1], [0, 0, 1, 1], [], []>} : vector<8x128xf32>, vector<128x128xf32>, vector<8x128xf32> -> vector<8x128xf32>
    %c517 = arith.constant 517 : index
    %c0_12 = arith.constant 0 : index
    %32 = vector.load %arg2[%c517, %c0_12] : memref<519x128xf32, #tpu.memory_space<vmem>>, vector<1x128xf32>
    %33 = vector.broadcast %32 : vector<1x128xf32> to vector<8x128xf32>
    %34 = arith.addf %31, %33 : vector<8x128xf32>
    %cst_13 = arith.constant 0.000000e+00 : f32
    %35 = vector.broadcast %cst_13 : f32 to vector<8x128xf32>
    %36 = arith.maximumf %34, %35 : vector<8x128xf32>
    %c256 = arith.constant 256 : index
    %c0_14 = arith.constant 0 : index
    %37 = vector.load %arg2[%c256, %c0_14] : memref<519x128xf32, #tpu.memory_space<vmem>>, vector<128x128xf32>
    %cst_15 = arith.constant dense<0.000000e+00> : vector<8x128xf32>
    %38 = tpu.matmul %29, %37, %cst_15 {dimension_numbers = #tpu.dot_dimension_numbers<[1], [0], [0], [1], [0, 0, 1, 1], [], []>} : vector<8x128xf32>, vector<128x128xf32>, vector<8x128xf32> -> vector<8x128xf32>
    %c384 = arith.constant 384 : index
    %c0_16 = arith.constant 0 : index
    %39 = vector.load %arg2[%c384, %c0_16] : memref<519x128xf32, #tpu.memory_space<vmem>>, vector<128x128xf32>
    %cst_17 = arith.constant dense<0.000000e+00> : vector<8x128xf32>
    %40 = tpu.matmul %36, %39, %cst_17 {dimension_numbers = #tpu.dot_dimension_numbers<[1], [0], [0], [1], [0, 0, 1, 1], [], []>} : vector<8x128xf32>, vector<128x128xf32>, vector<8x128xf32> -> vector<8x128xf32>
    %41 = arith.addf %38, %40 : vector<8x128xf32>
    %c518 = arith.constant 518 : index
    %c0_18 = arith.constant 0 : index
    %42 = vector.load %arg2[%c518, %c0_18] : memref<519x128xf32, #tpu.memory_space<vmem>>, vector<1x128xf32>
    %43 = vector.broadcast %42 : vector<1x128xf32> to vector<8x128xf32>
    %44 = arith.addf %41, %43 : vector<8x128xf32>
    %45 = math.tanh %44 : vector<8x128xf32>
    %c0_19 = arith.constant 0 : index
    %c0_20 = arith.constant 0 : index
    %46 = vector.load %arg3[%c0_19, %c0_20] : memref<8x128xf32, #tpu.memory_space<vmem>>, vector<8x128xf32>
    tpu.vector_store %arg3[%c0_19, %c0_20], %45 {strides = array<i32>} : memref<8x128xf32, #tpu.memory_space<vmem>>, vector<8x128xf32>,
    return
  }
  func.func @transform_0(%arg0: i32) -> (i32, i32) {
    %c0_i32 = arith.constant 0 : i32
    %c0_i32_0 = arith.constant 0 : i32
    return %arg0, %c0_i32 : i32, i32
  }
  func.func @transform_1(%arg0: i32) -> (i32, i32) {
    %c0_i32 = arith.constant 0 : i32
    %c0_i32_0 = arith.constant 0 : i32
    %c0_i32_1 = arith.constant 0 : i32
    return %c0_i32, %c0_i32_0 : i32, i32
  }
  func.func @transform_2(%arg0: i32) -> (i32, i32) {
    %c0_i32 = arith.constant 0 : i32
    %c0_i32_0 = arith.constant 0 : i32
    return %arg0, %c0_i32 : i32, i32
  }
}

</mosaic_0001>

<bundles_post_ra>
// kernel: tpu_custom_call.1
= control target key start
LH: loop header
LB: loop body
LE: loop exit
PB: predicated region body
PF: predicated region fallthrough
CT: control target
= control target key end

     0   :  { %7 = vsyncpa [#allocation3], 0  ;;  %s827_s0 = inlined_call_operand.vmem [shape: f32[8,3], index: 0, kind: input, shape index: {}]   ;;  %s828_s1 = inlined_call_operand.hbm [shape: f32[519,128], index: 1, kind: input, shape index: {}]   ;;  %s829_s2 = inlined_call_operand.hbm [shape: f32[8,128], index: 2, kind: output, shape index: {}]  }
   0x1   :  { %8 = vsyncpa [#allocation4], 0  ;;  %s720_s9 = smov [#allocation2]  }
   0x2   :  { %s16_s10 = sshll.u32 %s720_s9, 4  ;;  %s17_s10 = int_to_ptr.vmem [resolvable:$true] %s16_s10 }
   0x3   :  { %s684_s11 = scalar_lea.vmem %s17_s10, 8320  ;;  %p689_p1 = scmp.lt.s32.totalorder %s17_s10, %s17_s10 }
   0x4   :  { %p685_p0 = scmp.ne.s32.totalorder %s17_s10, %s684_s11  ;;  %p690_p2 = scmp.lt.s32.totalorder %s684_s11, %s684_s11 }
   0x6   :  { %p691_p3 = por %p690_p2, %p689_p1 }
   0x8   :  { %p692_p4 = pnand %p691_p3, %p685_p0 }
   0xa   :  { %695 = shalt.err (!%p692_p4)
}
   0xb   :  { %s721_s12 = smov 128   ;;  %s722_s13 = smov 8  }
   0xc   :  { %22 = dma.hbm_to_vmem [thread:$0]  %s828_s1, 8320, %s17_s10, [#allocation3], %s721_s12, %s721_s12, %s722_s13  }
   0xd   :  { %716 = dma.done.wait [#allocation3], 8320  }
   0xe   :  { %717 = vsyncadd [#allocation3], 4294958976  ;;  %v723_v0 = vmov 0   ;;  %v724_v1 = vmov 2   ;;  %v725_v2 = vmov 0.0   ;;  %v26_v3 = vld [vmem:[%s827_s0] sm:$0xff] }
   0xf   :  { %670 = vset.pattern.permute.xlu0 %v723_v0  ;;  %672 = vset.pattern.permute.xlu1 %v724_v1  ;;  %v82_v4 = vld [vmem:[#allocation2 + $0x78] sm:$0xff]  ;;  %v81_v6 = vld [vmem:[#allocation2 + $0x70] sm:$0xff]  ;;  %v80_v8 = vld [vmem:[#allocation2 + $0x68] sm:$0xff]  ;;  %v726_v10 = vmov 1   ;;  %vm727_vm0 = vmmov 0   ;;  %s728_s0 = smov [#allocation5]  }
  0x10   :  { %521 = vmatprep.subr.mxu0 %v725_v2  ;;  %556 = vmatprep.subr.mxu1 %v725_v2  ;;  %v174_v5 = vld [vmem:[#allocation2 + $0xf8] sm:$0xff]  ;;  %v173_v7 = vld [vmem:[#allocation2 + $0xf0] sm:$0xff]  ;;  %v172_v9 = vld [vmem:[#allocation2 + $0xe8] sm:$0xff]  ;;  %s437_s1 = sshll.u32 %s728_s0, 4  ;;  %s438_s1 = int_to_ptr.vmem [resolvable:$true] %s437_s1 }
  0x11   :  { %30 = vperm.xlu0 %670, %v26_v3   ;;  %51 = vperm.xlu1 %672, %v26_v3   ;;  %v79_v11 = vld [vmem:[#allocation2 + $0x60] sm:$0xff]  ;;  %v78_v13 = vld [vmem:[#allocation2 + $0x58] sm:$0xff]  ;;  %v77_v15 = vld [vmem:[#allocation2 + $0x50] sm:$0xff]  ;;  %s696_s18 = scalar_lea.vmem %s438_s1, 128  ;;  %p701_p6 = scmp.lt.s32.totalorder %s438_s1, %s438_s1 }
  0x12   :  { %522 = vmatpush3.msra.mxu0 %v82_v4  ;;  %557 = vmatpush3.msra.mxu1 %v174_v5  ;;  %v171_v12 = vld [vmem:[#allocation2 + $0xe0] sm:$0xff]  ;;  %v170_v14 = vld [vmem:[#allocation2 + $0xd8] sm:$0xff]  ;;  %v169_v16 = vld [vmem:[#allocation2 + $0xd0] sm:$0xff]  ;;  %p697_p5 = scmp.ne.s32.totalorder %s438_s1, %s696_s18  ;;  %p702_p7 = scmp.lt.s32.totalorder %s696_s18, %s696_s18 }
  0x13   :  { %523 = vmatprep.subr.mxu0 %v725_v2  ;;  %558 = vmatprep.subr.mxu1 %v725_v2  ;;  %v76_v17 = vld [vmem:[#allocation2 + $0x48] sm:$0xff]  ;;  %v75_v19 = vld [vmem:[#allocation2 + $0x40] sm:$0xff]  ;;  %v74_v21 = vld [vmem:[#allocation2 + $0x38] sm:$0xff] }
  0x14   :  { %524 = vmatpush3.msra.mxu0 %v81_v6  ;;  %559 = vmatpush3.msra.mxu1 %v173_v7  ;;  %v168_v18 = vld [vmem:[#allocation2 + $0xc8] sm:$0xff]  ;;  %v167_v20 = vld [vmem:[#allocation2 + $0xc0] sm:$0xff]  ;;  %v166_v22 = vld [vmem:[#allocation2 + $0xb8] sm:$0xff]  ;;  %p703_p8 = por %p702_p7, %p701_p6 }
  0x15   :  { %671 = vset.pattern.permute.xlu0 %v726_v10  ;;  %525 = vmatprep.subr.mxu0 %v725_v2  ;;  %v73_v23 = vld [vmem:[#allocation2 + $0x30] sm:$0xff]  ;;  %v72_v25 = vld [vmem:[#allocation2 + $0x28] sm:$0xff]  ;;  %v71_v27 = vld [vmem:[#allocation2 + $0x20] sm:$0xff] }
  0x16   :  { %40 = vperm.xlu0 %671, %v26_v3   ;;  %560 = vmatprep.subr.mxu1 %v725_v2  ;;  %v165_v24 = vld [vmem:[#allocation2 + $0xb0] sm:$0xff]  ;;  %v164_v26 = vld [vmem:[#allocation2 + $0xa8] sm:$0xff]  ;;  %v163_v28 = vld [vmem:[#allocation2 + $0xa0] sm:$0xff]  ;;  %p704_p9 = pnand %p703_p8, %p697_p5 }
  0x17   :  { %526 = vmatpush3.msra.mxu0 %v80_v8  ;;  %561 = vmatpush3.msra.mxu1 %v172_v9  ;;  %v70_v29 = vld [vmem:[#allocation2 + $0x18] sm:$0xff]  ;;  %v69_v31 = vld [vmem:[#allocation2 + $0x10] sm:$0xff]  ;;  %v68_v33 = vld [vmem:[#allocation2 + $0x8] sm:$0xff] }
  0x18   :  { %527 = vmatprep.subr.mxu0 %v725_v2  ;;  %562 = vmatprep.subr.mxu1 %v725_v2  ;;  %v162_v30 = vld [vmem:[#allocation2 + $0x98] sm:$0xff]  ;;  %v161_v32 = vld [vmem:[#allocation2 + $0x90] sm:$0xff]  ;;  %v160_v34 = vld [vmem:[#allocation2 + $0x88] sm:$0xff] }
  0x19   :  { %528 = vmatpush3.msra.mxu0 %v79_v11  ;;  %563 = vmatpush3.msra.mxu1 %v171_v12  ;;  %v67_v35 = vld [vmem:[#allocation2] sm:$0xff]  ;;  %v282_v51 = vld [vmem:[#allocation2 + $0x1f8] sm:$0xff]  ;;  %v281_v53 = vld [vmem:[#allocation2 + $0x1f0] sm:$0xff] }
  0x1a   :  { %529 = vmatprep.subr.mxu0 %v725_v2  ;;  %564 = vmatprep.subr.mxu1 %v725_v2  ;;  %v159_v36 = vld [vmem:[#allocation2 + $0x80] sm:$0xff]  ;;  %v266_v52 = vld [vmem:[#allocation2 + $0x178] sm:$0xff]  ;;  %v265_v54 = vld [vmem:[#allocation2 + $0x170] sm:$0xff] }
  0x1b   :  { %530 = vmatpush3.msra.mxu0 %v78_v13  ;;  %565 = vmatpush3.msra.mxu1 %v170_v14  ;;  %v446_v38 = vld [vmem:[#allocation2 + $0x200] ss:$0 sm:$0xff]  ;;  %v447_v39 = vld [vmem:[#allocation2 + $0x201] ss:$0 sm:$0xff]  ;;  %v448_v40 = vld [vmem:[#allocation2 + $0x202] ss:$0 sm:$0xff] }
  0x1c   :  { %531 = vmatprep.subr.mxu0 %v725_v2  ;;  %566 = vmatprep.subr.mxu1 %v725_v2  ;;  %v449_v47 = vld [vmem:[#allocation2 + $0x203] ss:$0 sm:$0xff]  ;;  %v280_v55 = vld [vmem:[#allocation2 + $0x1e8] sm:$0xff]  ;;  %v278_v59 = vld [vmem:[#allocation2 + $0x1d8] sm:$0xff] }
  0x1d   :  { %532 = vmatpush3.msra.mxu0 %v77_v15  ;;  %567 = vmatpush3.msra.mxu1 %v169_v16  ;;  %v264_v56 = vld [vmem:[#allocation2 + $0x168] sm:$0xff]  ;;  %v279_v57 = vld [vmem:[#allocation2 + $0x1e0] sm:$0xff]  ;;  %v262_v60 = vld [vmem:[#allocation2 + $0x158] sm:$0xff] }
  0x1e   :  { %533 = vmatprep.subr.mxu0 %v725_v2  ;;  %568 = vmatprep.subr.mxu1 %v725_v2  ;;  %v263_v58 = vld [vmem:[#allocation2 + $0x160] sm:$0xff]  ;;  %v277_v61 = vld [vmem:[#allocation2 + $0x1d0] sm:$0xff]  ;;  %v276_v63 = vld [vmem:[#allocation2 + $0x1c8] sm:$0xff] }
  0x1f   :  { %534 = vmatpush3.msra.mxu0 %v76_v17  ;;  %569 = vmatpush3.msra.mxu1 %v168_v18  ;;  %v261_v62 = vld [vmem:[#allocation2 + $0x150] sm:$0xff]  ;;  %v260_v0 = vld [vmem:[#allocation2 + $0x148] sm:$0xff]  ;;  %v259_v3 = vld [vmem:[#allocation2 + $0x140] sm:$0xff] }
  0x20   :  { %535 = vmatprep.subr.mxu0 %v725_v2  ;;  %570 = vmatprep.subr.mxu1 %v725_v2  ;;  %v274_v4 = vld [vmem:[#allocation2 + $0x1b8] sm:$0xff]  ;;  %v273_v6 = vld [vmem:[#allocation2 + $0x1b0] sm:$0xff]  ;;  %v272_v8 = vld [vmem:[#allocation2 + $0x1a8] sm:$0xff] }
  0x21   :  { %536 = vmatpush3.msra.mxu0 %v75_v19  ;;  %571 = vmatpush3.msra.mxu1 %v167_v20  ;;  %v258_v5 = vld [vmem:[#allocation2 + $0x138] sm:$0xff]  ;;  %v257_v7 = vld [vmem:[#allocation2 + $0x130] sm:$0xff]  ;;  %v256_v9 = vld [vmem:[#allocation2 + $0x128] sm:$0xff] }
  0x22   :  { %537 = vmatprep.subr.mxu0 %v725_v2  ;;  %572 = vmatprep.subr.mxu1 %v725_v2  ;;  %v271_v10 = vld [vmem:[#allocation2 + $0x1a0] sm:$0xff]  ;;  %v270_v12 = vld [vmem:[#allocation2 + $0x198] sm:$0xff]  ;;  %v269_v14 = vld [vmem:[#allocation2 + $0x190] sm:$0xff] }
  0x23   :  { %538 = vmatpush3.msra.mxu0 %v74_v21  ;;  %573 = vmatpush3.msra.mxu1 %v166_v22  ;;  %v255_v11 = vld [vmem:[#allocation2 + $0x120] sm:$0xff]  ;;  %v254_v13 = vld [vmem:[#allocation2 + $0x118] sm:$0xff]  ;;  %v253_v15 = vld [vmem:[#allocation2 + $0x110] sm:$0xff] }
  0x24   :  { %539 = vmatprep.subr.mxu0 %v725_v2  ;;  %574 = vmatprep.subr.mxu1 %v725_v2  ;;  %v268_v16 = vld [vmem:[#allocation2 + $0x188] sm:$0xff]  ;;  %v267_v18 = vld [vmem:[#allocation2 + $0x180] sm:$0xff] }
  0x25   :  { %540 = vmatpush3.msra.mxu0 %v73_v23  ;;  %575 = vmatpush3.msra.mxu1 %v165_v24  ;;  %v252_v17 = vld [vmem:[#allocation2 + $0x108] sm:$0xff]  ;;  %v251_v19 = vld [vmem:[#allocation2 + $0x100] sm:$0xff] }
  0x26   :  { %541 = vmatprep.subr.mxu0 %v725_v2  ;;  %576 = vmatprep.subr.mxu1 %v725_v2  ;;  %v450_v20 = vld [vmem:[#allocation2 + $0x204] ss:$0 sm:$0xff]  ;;  %v451_v21 = vld [vmem:[#allocation2 + $0x205] ss:$0 sm:$0xff] }
  0x27   :  { %542 = vmatpush3.msra.mxu0 %v72_v25  ;;  %577 = vmatpush3.msra.mxu1 %v164_v26 }
  0x28   :  { %543 = vmatprep.subr.mxu0 %v725_v2  ;;  %578 = vmatprep.subr.mxu1 %v725_v2 }
  0x29   :  { %544 = vmatpush3.msra.mxu0 %v71_v27  ;;  %579 = vmatpush3.msra.mxu1 %v163_v28 }
  0x2a   :  { %545 = vmatprep.subr.mxu0 %v725_v2  ;;  %580 = vmatprep.subr.mxu1 %v725_v2 }
  0x2b   :  { %546 = vmatpush3.msra.mxu0 %v70_v29  ;;  %581 = vmatpush3.msra.mxu1 %v162_v30 }
  0x2c   :  { %547 = vmatprep.subr.mxu0 %v725_v2  ;;  %582 = vmatprep.subr.mxu1 %v725_v2 }
  0x2d   :  { %548 = vmatpush3.msra.mxu0 %v69_v31  ;;  %583 = vmatpush3.msra.mxu1 %v161_v32  ;;  %v452_v32 = vld [vmem:[#allocation2 + $0x206] ss:$0 sm:$0xff] }
  0x2e   :  { %549 = vmatprep.subr.mxu0 %v725_v2  ;;  %584 = vmatprep.subr.mxu1 %v725_v2 }
  0x2f   :  { %550 = vmatpush3.msra.mxu0 %v68_v33  ;;  %585 = vmatpush3.msra.mxu1 %v160_v34 }
  0x30   :  { %551 = vmatprep.subr.mxu0 %v725_v2  ;;  %586 = vmatprep.subr.mxu1 %v725_v2 }
  0x31   :  { %552 = vmatpush3.msra.mxu0 %v67_v35  ;;  %553 = vmatprep.mubr.msk.f32.mxu0 %vm727_vm0, %v725_v2 }
  0x32   :  { %587 = vmatpush3.msra.mxu1 %v159_v36  ;;  %588 = vmatprep.mubr.msk.f32.mxu1 %vm727_vm0, %v725_v2 }
  0x33   :  { %591 = vmatprep.subr.mxu0 %v725_v2  ;;  %626 = vmatprep.subr.mxu1 %v725_v2 }
  0x34   :  { %673 = vset.pattern.permute.xlu0 %v724_v1  ;;  %v275_v1 = vld [vmem:[#allocation2 + $0x1c0] sm:$0xff] }
  0x8c   :  { %v31_v37 = vpop.permute.xlu0 %30  ;;  %v52_v41 = vpop.permute.xlu1 %51 }
  0x8d   :  { %v37_v43 = vmul.f32 %v446_v38, %v31_v37  ;;  %v58_v45 = vmul.f32 %v448_v40, %v52_v41 }
  0x91   :  { %v41_v42 = vpop.permute.xlu0 %40 }
  0x92   :  { %v47_v44 = vmul.f32 %v447_v39, %v41_v42 }
  0x94   :  { %v48_v46 = vadd.f32 %v47_v44, %v37_v43 }
  0x96   :  { %v59_v48 = vadd.f32 %v58_v45, %v48_v46 }
  0x98   :  { %v65_v49 = vadd.f32 %v449_v47, %v59_v48 }
  0x9a   :  { %v66_v50 = vmax.f32 %v65_v49, 0.0 }
  0x9c   :  { %554 = vmatmul.mubr.f32.vlgmr.msra.gmra.mxu0 %v66_v50  ;;  %589 = vmatmul.mubr.f32.vlgmr.msra.gmra.mxu1 %v66_v50 }
  0x9d   :  { %592 = vmatpush3.msra.mxu0 %v282_v51  ;;  %627 = vmatpush3.msra.mxu1 %v266_v52 }
  0x9e   :  { %593 = vmatprep.subr.mxu0 %v725_v2  ;;  %628 = vmatprep.subr.mxu1 %v725_v2 }
  0x9f   :  { %594 = vmatpush3.msra.mxu0 %v281_v53  ;;  %629 = vmatpush3.msra.mxu1 %v265_v54 }
  0xa0   :  { %595 = vmatprep.subr.mxu0 %v725_v2  ;;  %630 = vmatprep.subr.mxu1 %v725_v2 }
  0xa1   :  { %596 = vmatpush3.msra.mxu0 %v280_v55  ;;  %631 = vmatpush3.msra.mxu1 %v264_v56 }
  0xa2   :  { %597 = vmatprep.subr.mxu0 %v725_v2  ;;  %632 = vmatprep.subr.mxu1 %v725_v2 }
  0xa3   :  { %598 = vmatpush3.msra.mxu0 %v279_v57  ;;  %633 = vmatpush3.msra.mxu1 %v263_v58 }
  0xa4   :  { %599 = vmatprep.subr.mxu0 %v725_v2  ;;  %634 = vmatprep.subr.mxu1 %v725_v2 }
  0xa5   :  { %600 = vmatpush3.msra.mxu0 %v278_v59  ;;  %635 = vmatpush3.msra.mxu1 %v262_v60 }
  0xa6   :  { %601 = vmatprep.subr.mxu0 %v725_v2  ;;  %636 = vmatprep.subr.mxu1 %v725_v2 }
  0xa7   :  { %602 = vmatpush3.msra.mxu0 %v277_v61  ;;  %637 = vmatpush3.msra.mxu1 %v261_v62 }
  0xa8   :  { %603 = vmatprep.subr.mxu0 %v725_v2  ;;  %638 = vmatprep.subr.mxu1 %v725_v2 }
  0xa9   :  { %604 = vmatpush3.msra.mxu0 %v276_v63  ;;  %639 = vmatpush3.msra.mxu1 %v260_v0 }
  0xaa   :  { %605 = vmatprep.subr.mxu0 %v725_v2  ;;  %640 = vmatprep.subr.mxu1 %v725_v2 }
  0xab   :  { %606 = vmatpush3.msra.mxu0 %v275_v1  ;;  %641 = vmatpush3.msra.mxu1 %v259_v3 }
  0xac   :  { %607 = vmatprep.subr.mxu0 %v725_v2  ;;  %642 = vmatprep.subr.mxu1 %v725_v2 }
  0xad   :  { %608 = vmatpush3.msra.mxu0 %v274_v4  ;;  %643 = vmatpush3.msra.mxu1 %v258_v5 }
  0xae   :  { %609 = vmatprep.subr.mxu0 %v725_v2  ;;  %644 = vmatprep.subr.mxu1 %v725_v2 }
  0xaf   :  { %610 = vmatpush3.msra.mxu0 %v273_v6  ;;  %645 = vmatpush3.msra.mxu1 %v257_v7 }
  0xb0   :  { %611 = vmatprep.subr.mxu0 %v725_v2  ;;  %646 = vmatprep.subr.mxu1 %v725_v2 }
  0xb1   :  { %612 = vmatpush3.msra.mxu0 %v272_v8  ;;  %647 = vmatpush3.msra.mxu1 %v256_v9 }
  0xb2   :  { %613 = vmatprep.subr.mxu0 %v725_v2  ;;  %648 = vmatprep.subr.mxu1 %v725_v2 }
  0xb3   :  { %614 = vmatpush3.msra.mxu0 %v271_v10  ;;  %649 = vmatpush3.msra.mxu1 %v255_v11 }
  0xb4   :  { %615 = vmatprep.subr.mxu0 %v725_v2  ;;  %650 = vmatprep.subr.mxu1 %v725_v2 }
  0xb5   :  { %616 = vmatpush3.msra.mxu0 %v270_v12  ;;  %651 = vmatpush3.msra.mxu1 %v254_v13 }
  0xb6   :  { %617 = vmatprep.subr.mxu0 %v725_v2  ;;  %652 = vmatprep.subr.mxu1 %v725_v2 }
  0xb7   :  { %623 = vmatprep.mubr.msk.f32.mxu0 %vm727_vm0, %v725_v2  ;;  %658 = vmatprep.mubr.msk.f32.mxu1 %vm727_vm0, %v725_v2 }
  0xb8   :  { %618 = vmatpush3.msra.mxu0 %v269_v14  ;;  %653 = vmatpush3.msra.mxu1 %v253_v15 }
  0xb9   :  { %619 = vmatprep.subr.mxu0 %v725_v2  ;;  %654 = vmatprep.subr.mxu1 %v725_v2 }
  0xba   :  { %620 = vmatpush3.msra.mxu0 %v268_v16  ;;  %655 = vmatpush3.msra.mxu1 %v252_v17 }
  0xbb   :  { %621 = vmatprep.subr.mxu0 %v725_v2  ;;  %656 = vmatprep.subr.mxu1 %v725_v2 }
  0xbc   :  { %622 = vmatpush3.msra.mxu0 %v267_v18  ;;  %657 = vmatpush3.msra.mxu1 %v251_v19 }
 0x15c   :  { %v154_v22 = vpop.f32.mrf.mxu0  ;;  %v246_v23 = vpop.f32.mrf.mxu1 }
 0x15d   :  { %v155_v24 = vadd.f32 %v450_v20, %v154_v22  ;;  %v247_v25 = vadd.f32 %v451_v21, %v246_v23 }
 0x15e   :  { %v555_v26 = vpop.f32.mrf.mxu0  ;;  %v590_v27 = vpop.f32.mrf.mxu1 }
 0x15f   :  { %v158_v28 = vmax.f32 %v155_v24, 0.0  ;;  %v250_v29 = vmax.f32 %v247_v25, 0.0 }
 0x161   :  { %624 = vmatmul.mubr.f32.vlgmr.msra.gmra.mxu0 %v250_v29  ;;  %659 = vmatmul.mubr.f32.vlgmr.msra.gmra.mxu1 %v158_v28 }
 0x221   :  { %v349_v30 = vpop.f32.mrf.mxu0  ;;  %v419_v31 = vpop.f32.mrf.mxu1 }
 0x222   :  { %v420_v2 = vadd.f32 %v419_v31, %v349_v30 }
 0x223   :  { %v625_v33 = vpop.f32.mrf.mxu0  ;;  %v660_v34 = vpop.f32.mrf.mxu1 }
 0x224   :  { %v428_v35 = vadd.f32 %v452_v32, %v420_v2 }
 0x226   :  { %674 = vtanh.f32 %v428_v35 }
 0x233   :  { %v675_v36 = vpop.eup %674 }
 0x234   :  { %430 = vst [vmem:[#allocation5] sm:$0xff] %v675_v36 }
 0x235   :  { %707 = shalt.err (!%p704_p9)
}
 0x236   :  { %440 = dma.vmem_to_hbm [thread:$0]  %s438_s1, 128, %s829_s2, [#allocation4]  }
 0x237   :  { %718 = dma.done.wait [#allocation4], 128  }
 0x238   :  { %719 = vsyncadd [#allocation4], 4294967168 }
 0x239   :  { %444 = vsyncpa [#allocation3], 1 }
 0x23a   :  { %445 = vsyncpa [#allocation4], 1 }

</bundles_post_ra>
